<compile_context>
chip_gen: v5e
topology: v5e:2x2
jax: 0.10.0
libtpu: 0.0.40
codegen_flags: <defaults>
</compile_context>

<pallas_src>
import functools
import math

import jax
import jax.numpy as jnp
from jax.experimental import pallas as pl
from jax.experimental.pallas import tpu as pltpu

_MIB = 1024 * 1024


# ---------------------------------------------------------------------------
# Fused statistics kernel
# ---------------------------------------------------------------------------
def _stats_kernel(pred_ref, tgt_ref, acc_ref):
    """One (batch, W-tile, H-tile) block.

    pred_ref: (C, th, tw) logits     tgt_ref: (th, tw) int32
    acc_ref : (4*C, tw) f32 fused accumulator, layout (stat-major):
              rows [0:C)   sum_h softmax * onehot          (intersection)
              rows [C:2C)  sum_h softmax                    (prob sum)
              rows [2C:3C) sum_h onehot                     (class counts)
              rows [3C:4C) sum_h onehot * (lse - logit)     (CE partials)
    The accumulator block stays resident across the H ("arbitrary") grid axis.
    """
    @pl.when(pl.program_id(2) == 0)
    def _():
        acc_ref[...] = jnp.zeros_like(acc_ref)

    num_classes = pred_ref.shape[0]
    t = tgt_ref[...]                                        # (th, tw) int32

    # Stable softmax / log-sum-exp over channels.  Logit planes are re-read
    # from the VMEM input block (vld is cheap) instead of kept live, cutting
    # scratch pressure roughly in half.
    m = pred_ref[0].astype(jnp.float32)
    for c in range(1, num_classes):
        m = jnp.maximum(m, pred_ref[c].astype(jnp.float32))
    exps = [jnp.exp(pred_ref[c].astype(jnp.float32) - m)
            for c in range(num_classes)]
    s = exps[0]
    for c in range(1, num_classes):
        s = s + exps[c]
    inv_s = pl.reciprocal(s, approx=True)                   # EUP vrcp slot
    lse = jnp.log(s) + m

    inter_rows, psum_rows, tsum_rows, ce_rows = [], [], [], []
    for c in range(num_classes):
        prob_c = exps[c] * inv_s                            # softmax[c]
        hit_f = (t == c).astype(jnp.float32)                # onehot plane
        ce_c = lse - pred_ref[c].astype(jnp.float32)        # -log softmax[c]
        inter_rows.append(jnp.sum(hit_f * prob_c, axis=0, keepdims=True))
        psum_rows.append(jnp.sum(prob_c, axis=0, keepdims=True))
        tsum_rows.append(jnp.sum(hit_f, axis=0, keepdims=True))
        ce_rows.append(jnp.sum(hit_f * ce_c, axis=0, keepdims=True))

    # Single lane/sublane-dense RMW of the fused (4C, tw) accumulator.
    acc_ref[...] += jnp.concatenate(
        inter_rows + psum_rows + tsum_rows + ce_rows, axis=0)


# ---------------------------------------------------------------------------
# Generation-aware tiling
# ---------------------------------------------------------------------------
def _vmem_capacity_bytes():
    try:
        info = pltpu.get_tpu_info()
        cap = getattr(info, "vmem_capacity_bytes", None)
        if cap:
            return int(cap)
    except Exception:
        pass
    return 64 * _MIB  # conservative default (v7x-class per-core VMEM)


def _pick_divisor_tile(extent, unit, max_tile):
    """Largest t <= max_tile with extent % t == 0 and t % unit == 0; else extent."""
    if extent <= max_tile:
        return extent
    t = (max_tile // unit) * unit
    while t >= unit:
        if extent % t == 0:
            return t
        t -= unit
    return extent


def _tiling_config(c, h, w, pred_dtype, tgt_dtype):
    cap = _vmem_capacity_bytes()
    big_vmem = cap >= 100 * _MIB                 # v5e / v6e: 128 MiB parts
    vmem_limit = (96 if big_vmem else 48) * _MIB
    max_th = 1024 if big_vmem else 256
    max_tw = w if big_vmem else 512              # W split feeds v7x's 2 TCs

    p_isz = jnp.dtype(pred_dtype).itemsize
    t_isz = jnp.dtype(tgt_dtype).itemsize
    sub_unit = max(8, 32 // max(p_isz, 1))       # 8 for f32, 16 for bf16

    tile_w = _pick_divisor_tile(w, 128, max_tw)

    # VMEM budget: double-buffered pred+target blocks, resident accumulator,
    # plus ~(C+3) live f32 temporaries of shape (tile_h, tile_w).
    budget = int(0.6 * vmem_limit)
    bytes_per_h_row = tile_w * (2 * (c * p_isz + t_isz) + (c + 3) * 4)
    th_cap = max(sub_unit,
                 (budget // max(bytes_per_h_row, 1)) // sub_unit * sub_unit)
    tile_h = _pick_divisor_tile(h, sub_unit, min(max_th, th_cap))

    if tile_h == h:  # no divisor fit the budget; raise the limit best-effort
        needed = h * bytes_per_h_row + 8 * _MIB
        if needed > vmem_limit:
            vmem_limit = min(max(cap - 8 * _MIB, vmem_limit), needed)
    return tile_h, tile_w, vmem_limit


def _fused_stats(pred, target_hw):
    """Returns (N, 4*C, W) f32 partial sums (reduced over H) per batch element."""
    n, c, h, w = pred.shape
    tile_h, tile_w, vmem_limit = _tiling_config(c, h, w, pred.dtype,
                                                target_hw.dtype)
    grid = (n, w // tile_w, h // tile_h)
    return pl.pallas_call(
        _stats_kernel,
        out_shape=jax.ShapeDtypeStruct((n, 4 * c, w), jnp.float32),
        grid_spec=pltpu.PrefetchScalarGridSpec(
            num_scalar_prefetch=0,
            grid=grid,
            in_specs=[
                pl.BlockSpec((None, c, tile_h, tile_w),
                             lambda i, wj, hj: (i, 0, hj, wj)),
                pl.BlockSpec((None, tile_h, tile_w),
                             lambda i, wj, hj: (i, hj, wj)),
            ],
            out_specs=pl.BlockSpec((None, 4 * c, tile_w),
                                   lambda i, wj, hj: (i, 0, wj)),
        ),
        compiler_params=pltpu.CompilerParams(
            dimension_semantics=("parallel", "parallel", "arbitrary"),
            vmem_limit_bytes=vmem_limit),
    )(pred, target_hw)


# ---------------------------------------------------------------------------
# Loss composition (tiny O(C*W) glue, matches the PyTorch reference)
# ---------------------------------------------------------------------------
def bce_tversky_loss(pred, target, *, num_classes, alpha, beta, phi,
                     cel, ftl, eps=1e-7):
    if abs(cel + ftl - 1.0) > 1e-6:
        raise ValueError(
            'Cross Entropy weight and Tversky weight should sum to 1')
    n, c, h, w = pred.shape
    if c != num_classes:
        raise ValueError('pred channel dim must equal num_classes')
    if num_classes == 1:
        # TODO(synk): the binary (sigmoid, num_classes == 1) branch of
        # tversky_loss is not implemented; only the multi-class softmax path.
        raise NotImplementedError('num_classes == 1 branch not implemented')

    target_hw = jnp.squeeze(target, axis=1).astype(jnp.int32)

    # Batch reduction (the reference sums dims (0, 2): batch and H).
    stats = jnp.sum(_fused_stats(pred, target_hw), axis=0)   # (4C, W) f32
    inter = stats[:c]                                        # (C, W)
    psum = stats[c:2 * c]                                    # (C, W)
    tsum = stats[2 * c:3 * c]                                # (C, W)
    ce_per_class = jnp.sum(stats[3 * c:4 * c], axis=1)       # (C,)
    counts = jnp.sum(tsum, axis=1)                           # (C,) pixels/class

    # self.weights(): d_c = count_c / sum(counts), class weight = 1 - d_c.
    class_w = 1.0 - counts / jnp.sum(counts)

    # nn.CrossEntropyLoss(weight=class_w), reduction='mean'
    # (weighted mean: divide by the summed weights of the targets).
    ce_seg = jnp.sum(class_w * ce_per_class) / jnp.sum(class_w * counts)

    # tversky_loss: dims=(0, 2) reduction leaves a (C, W) map, then mean.
    fps = psum - inter
    fns = tsum - inter
    tversky = jnp.mean(inter / (inter + alpha * fps + beta * fns + eps))
    tv = (1.0 - tversky) ** phi

    return cel * ce_seg + ftl * tv


class BCETversky:
    """JAX/Pallas port of the PyTorch BCE_Tversky module's forward pass."""

    def __init__(self, num_classes, alpha, beta, phi, cel, ftl):
        self.num_classes = num_classes
        self.alpha = float(alpha)
        self.beta = float(beta)
        self.phi = float(phi)
        self.cel = float(cel)
        self.ftl = float(ftl)
        self._fn = jax.jit(functools.partial(
            bce_tversky_loss, num_classes=num_classes, alpha=self.alpha,
            beta=self.beta, phi=self.phi, cel=self.cel, ftl=self.ftl))

    def __call__(self, pred, target):
        if not math.isclose(self.cel + self.ftl, 1.0, rel_tol=0.0,
                            abs_tol=1e-6):
            raise ValueError(
                'Cross Entropy weight and Tversky weight should sum to 1')
        return self._fn(pred, target)


if __name__ == "__main__":
    key = jax.random.PRNGKey(0)
    k1, k2 = jax.random.split(key)
    N, C, H, W = 2, 4, 16, 16
    pred = jax.random.normal(k1, (N, C, H, W), dtype=jnp.float32)
    target = jax.random.randint(k2, (N, 1, H, W), 0, C, dtype=jnp.int32)

    loss_fn = BCETversky(num_classes=C, alpha=0.3, beta=0.7, phi=0.75,
                         cel=0.5, ftl=0.5)
    loss = loss_fn(pred, target)
    jax.block_until_ready(loss)
    print("KERNEL_OK")
</pallas_src>

<mosaic_0001>
module attributes {stable_mosaic.version = 11 : i64} {
  func.func @_stats_kernel(%arg0: i32, %arg1: i32, %arg2: i32, %arg3: memref<1x4x16x16xf32, #tpu.memory_space<vmem>>, %arg4: memref<1x16x16xi32, #tpu.memory_space<vmem>>, %arg5: memref<1x16x16xf32, #tpu.memory_space<vmem>>) attributes {dimension_semantics = [#tpu.dimension_semantics<parallel>, #tpu.dimension_semantics<parallel>, #tpu.dimension_semantics<arbitrary>], iteration_bounds = array<i64: 2, 1, 1>, scalar_prefetch = 0 : i64, scratch_operands = 0 : i64, tpu.core_type = #tpu.core_type<tc>, window_params = [{transform_indices = @transform_0, window_bounds = array<i64: 1, 4, 16, 16>}, {transform_indices = @transform_1, window_bounds = array<i64: 1, 16, 16>}, {transform_indices = @transform_2, window_bounds = array<i64: 1, 16, 16>}]} {
    %c0_i32 = arith.constant 0 : i32
    %0 = arith.cmpi eq, %arg2, %c0_i32 : i32
    %1 = arith.extui %0 : i1 to i32
    %c0_i32_0 = arith.constant 0 : i32
    %2 = arith.cmpi ne, %1, %c0_i32_0 : i32
    scf.if %2 {
      %cst_70 = arith.constant 0.000000e+00 : f32
      %117 = vector.broadcast %cst_70 : f32 to vector<16x16xf32>
      %c0_71 = arith.constant 0 : index
      %c0_72 = arith.constant 0 : index
      %c0_73 = arith.constant 0 : index
      %118 = vector.load %arg5[%c0_71, %c0_72, %c0_73] : memref<1x16x16xf32, #tpu.memory_space<vmem>>, vector<1x16x16xf32>
      %119 = vector.shape_cast %118 : vector<1x16x16xf32> to vector<16x16xf32>
      %120 = vector.shape_cast %117 : vector<16x16xf32> to vector<1x16x16xf32>
      tpu.vector_store %arg5[%c0_71, %c0_72, %c0_73], %120 {strides = array<i32>} : memref<1x16x16xf32, #tpu.memory_space<vmem>>, vector<1x16x16xf32>,
    } else {
    }
    %c0 = arith.constant 0 : index
    %c0_1 = arith.constant 0 : index
    %c0_2 = arith.constant 0 : index
    %3 = vector.load %arg4[%c0, %c0_1, %c0_2] : memref<1x16x16xi32, #tpu.memory_space<vmem>>, vector<1x16x16xi32>
    %4 = vector.shape_cast %3 : vector<1x16x16xi32> to vector<16x16xi32>
    %c0_3 = arith.constant 0 : index
    %c0_4 = arith.constant 0 : index
    %c0_5 = arith.constant 0 : index
    %c0_6 = arith.constant 0 : index
    %5 = vector.load %arg3[%c0_3, %c0_4, %c0_5, %c0_6] : memref<1x4x16x16xf32, #tpu.memory_space<vmem>>, vector<1x1x16x16xf32>
    %6 = vector.shape_cast %5 : vector<1x1x16x16xf32> to vector<16x16xf32>
    %c0_7 = arith.constant 0 : index
    %c1 = arith.constant 1 : index
    %c0_8 = arith.constant 0 : index
    %c0_9 = arith.constant 0 : index
    %7 = vector.load %arg3[%c0_7, %c1, %c0_8, %c0_9] : memref<1x4x16x16xf32, #tpu.memory_space<vmem>>, vector<1x1x16x16xf32>
    %8 = vector.shape_cast %7 : vector<1x1x16x16xf32> to vector<16x16xf32>
    %9 = arith.maximumf %6, %8 : vector<16x16xf32>
    %c0_10 = arith.constant 0 : index
    %c2 = arith.constant 2 : index
    %c0_11 = arith.constant 0 : index
    %c0_12 = arith.constant 0 : index
    %10 = vector.load %arg3[%c0_10, %c2, %c0_11, %c0_12] : memref<1x4x16x16xf32, #tpu.memory_space<vmem>>, vector<1x1x16x16xf32>
    %11 = vector.shape_cast %10 : vector<1x1x16x16xf32> to vector<16x16xf32>
    %12 = arith.maximumf %9, %11 : vector<16x16xf32>
    %c0_13 = arith.constant 0 : index
    %c3 = arith.constant 3 : index
    %c0_14 = arith.constant 0 : index
    %c0_15 = arith.constant 0 : index
    %13 = vector.load %arg3[%c0_13, %c3, %c0_14, %c0_15] : memref<1x4x16x16xf32, #tpu.memory_space<vmem>>, vector<1x1x16x16xf32>
    %14 = vector.shape_cast %13 : vector<1x1x16x16xf32> to vector<16x16xf32>
    %15 = arith.maximumf %12, %14 : vector<16x16xf32>
    %c0_16 = arith.constant 0 : index
    %c0_17 = arith.constant 0 : index
    %c0_18 = arith.constant 0 : index
    %c0_19 = arith.constant 0 : index
    %16 = vector.load %arg3[%c0_16, %c0_17, %c0_18, %c0_19] : memref<1x4x16x16xf32, #tpu.memory_space<vmem>>, vector<1x1x16x16xf32>
    %17 = vector.shape_cast %16 : vector<1x1x16x16xf32> to vector<16x16xf32>
    %18 = arith.subf %17, %15 : vector<16x16xf32>
    %19 = math.exp %18 : vector<16x16xf32>
    %c0_20 = arith.constant 0 : index
    %c1_21 = arith.constant 1 : index
    %c0_22 = arith.constant 0 : index
    %c0_23 = arith.constant 0 : index
    %20 = vector.load %arg3[%c0_20, %c1_21, %c0_22, %c0_23] : memref<1x4x16x16xf32, #tpu.memory_space<vmem>>, vector<1x1x16x16xf32>
    %21 = vector.shape_cast %20 : vector<1x1x16x16xf32> to vector<16x16xf32>
    %22 = arith.subf %21, %15 : vector<16x16xf32>
    %23 = math.exp %22 : vector<16x16xf32>
    %c0_24 = arith.constant 0 : index
    %c2_25 = arith.constant 2 : index
    %c0_26 = arith.constant 0 : index
    %c0_27 = arith.constant 0 : index
    %24 = vector.load %arg3[%c0_24, %c2_25, %c0_26, %c0_27] : memref<1x4x16x16xf32, #tpu.memory_space<vmem>>, vector<1x1x16x16xf32>
    %25 = vector.shape_cast %24 : vector<1x1x16x16xf32> to vector<16x16xf32>
    %26 = arith.subf %25, %15 : vector<16x16xf32>
    %27 = math.exp %26 : vector<16x16xf32>
    %c0_28 = arith.constant 0 : index
    %c3_29 = arith.constant 3 : index
    %c0_30 = arith.constant 0 : index
    %c0_31 = arith.constant 0 : index
    %28 = vector.load %arg3[%c0_28, %c3_29, %c0_30, %c0_31] : memref<1x4x16x16xf32, #tpu.memory_space<vmem>>, vector<1x1x16x16xf32>
    %29 = vector.shape_cast %28 : vector<1x1x16x16xf32> to vector<16x16xf32>
    %30 = arith.subf %29, %15 : vector<16x16xf32>
    %31 = math.exp %30 : vector<16x16xf32>
    %32 = arith.addf %19, %23 : vector<16x16xf32>
    %33 = arith.addf %32, %27 : vector<16x16xf32>
    %34 = arith.addf %33, %31 : vector<16x16xf32>
    %35 = tpu.reciprocal %34 {approx = true} : vector<16x16xf32> -> vector<16x16xf32>
    %36 = math.log %34 : vector<16x16xf32>
    %37 = arith.addf %36, %15 : vector<16x16xf32>
    %38 = arith.mulf %19, %35 : vector<16x16xf32>
    %c0_i32_32 = arith.constant 0 : i32
    %39 = vector.broadcast %c0_i32_32 : i32 to vector<16x16xi32>
    %40 = arith.cmpi eq, %4, %39 : vector<16x16xi32>
    %41 = arith.extui %40 : vector<16x16xi1> to vector<16x16xi32>
    %42 = arith.sitofp %41 : vector<16x16xi32> to vector<16x16xf32>
    %c0_33 = arith.constant 0 : index
    %c0_34 = arith.constant 0 : index
    %c0_35 = arith.constant 0 : index
    %c0_36 = arith.constant 0 : index
    %43 = vector.load %arg3[%c0_33, %c0_34, %c0_35, %c0_36] : memref<1x4x16x16xf32, #tpu.memory_space<vmem>>, vector<1x1x16x16xf32>
    %44 = vector.shape_cast %43 : vector<1x1x16x16xf32> to vector<16x16xf32>
    %45 = arith.subf %37, %44 : vector<16x16xf32>
    %46 = arith.mulf %42, %38 : vector<16x16xf32>
    %cst = arith.constant dense<0.000000e+00> : vector<16xf32>
    %47 = vector.multi_reduction <add>, %46, %cst [0] : vector<16x16xf32> to vector<16xf32>
    %48 = vector.shape_cast %47 : vector<16xf32> to vector<1x16xf32>
    %cst_37 = arith.constant dense<0.000000e+00> : vector<16xf32>
    %49 = vector.multi_reduction <add>, %38, %cst_37 [0] : vector<16x16xf32> to vector<16xf32>
    %50 = vector.shape_cast %49 : vector<16xf32> to vector<1x16xf32>
    %cst_38 = arith.constant dense<0.000000e+00> : vector<16xf32>
    %51 = vector.multi_reduction <add>, %42, %cst_38 [0] : vector<16x16xf32> to vector<16xf32>
    %52 = vector.shape_cast %51 : vector<16xf32> to vector<1x16xf32>
    %53 = arith.mulf %42, %45 : vector<16x16xf32>
    %cst_39 = arith.constant dense<0.000000e+00> : vector<16xf32>
    %54 = vector.multi_reduction <add>, %53, %cst_39 [0] : vector<16x16xf32> to vector<16xf32>
    %55 = vector.shape_cast %54 : vector<16xf32> to vector<1x16xf32>
    %56 = arith.mulf %23, %35 : vector<16x16xf32>
    %c1_i32 = arith.constant 1 : i32
    %57 = vector.broadcast %c1_i32 : i32 to vector<16x16xi32>
    %58 = arith.cmpi eq, %4, %57 : vector<16x16xi32>
    %59 = arith.extui %58 : vector<16x16xi1> to vector<16x16xi32>
    %60 = arith.sitofp %59 : vector<16x16xi32> to vector<16x16xf32>
    %c0_40 = arith.constant 0 : index
    %c1_41 = arith.constant 1 : index
    %c0_42 = arith.constant 0 : index
    %c0_43 = arith.constant 0 : index
    %61 = vector.load %arg3[%c0_40, %c1_41, %c0_42, %c0_43] : memref<1x4x16x16xf32, #tpu.memory_space<vmem>>, vector<1x1x16x16xf32>
    %62 = vector.shape_cast %61 : vector<1x1x16x16xf32> to vector<16x16xf32>
    %63 = arith.subf %37, %62 : vector<16x16xf32>
    %64 = arith.mulf %60, %56 : vector<16x16xf32>
    %cst_44 = arith.constant dense<0.000000e+00> : vector<16xf32>
    %65 = vector.multi_reduction <add>, %64, %cst_44 [0] : vector<16x16xf32> to vector<16xf32>
    %66 = vector.shape_cast %65 : vector<16xf32> to vector<1x16xf32>
    %cst_45 = arith.constant dense<0.000000e+00> : vector<16xf32>
    %67 = vector.multi_reduction <add>, %56, %cst_45 [0] : vector<16x16xf32> to vector<16xf32>
    %68 = vector.shape_cast %67 : vector<16xf32> to vector<1x16xf32>
    %cst_46 = arith.constant dense<0.000000e+00> : vector<16xf32>
    %69 = vector.multi_reduction <add>, %60, %cst_46 [0] : vector<16x16xf32> to vector<16xf32>
    %70 = vector.shape_cast %69 : vector<16xf32> to vector<1x16xf32>
    %71 = arith.mulf %60, %63 : vector<16x16xf32>
    %cst_47 = arith.constant dense<0.000000e+00> : vector<16xf32>
    %72 = vector.multi_reduction <add>, %71, %cst_47 [0] : vector<16x16xf32> to vector<16xf32>
    %73 = vector.shape_cast %72 : vector<16xf32> to vector<1x16xf32>
    %74 = arith.mulf %27, %35 : vector<16x16xf32>
    %c2_i32 = arith.constant 2 : i32
    %75 = vector.broadcast %c2_i32 : i32 to vector<16x16xi32>
    %76 = arith.cmpi eq, %4, %75 : vector<16x16xi32>
    %77 = arith.extui %76 : vector<16x16xi1> to vector<16x16xi32>
    %78 = arith.sitofp %77 : vector<16x16xi32> to vector<16x16xf32>
    %c0_48 = arith.constant 0 : index
    %c2_49 = arith.constant 2 : index
    %c0_50 = arith.constant 0 : index
    %c0_51 = arith.constant 0 : index
    %79 = vector.load %arg3[%c0_48, %c2_49, %c0_50, %c0_51] : memref<1x4x16x16xf32, #tpu.memory_space<vmem>>, vector<1x1x16x16xf32>
    %80 = vector.shape_cast %79 : vector<1x1x16x16xf32> to vector<16x16xf32>
    %81 = arith.subf %37, %80 : vector<16x16xf32>
    %82 = arith.mulf %78, %74 : vector<16x16xf32>
    %cst_52 = arith.constant dense<0.000000e+00> : vector<16xf32>
    %83 = vector.multi_reduction <add>, %82, %cst_52 [0] : vector<16x16xf32> to vector<16xf32>
    %84 = vector.shape_cast %83 : vector<16xf32> to vector<1x16xf32>
    %cst_53 = arith.constant dense<0.000000e+00> : vector<16xf32>
    %85 = vector.multi_reduction <add>, %74, %cst_53 [0] : vector<16x16xf32> to vector<16xf32>
    %86 = vector.shape_cast %85 : vector<16xf32> to vector<1x16xf32>
    %cst_54 = arith.constant dense<0.000000e+00> : vector<16xf32>
    %87 = vector.multi_reduction <add>, %78, %cst_54 [0] : vector<16x16xf32> to vector<16xf32>
    %88 = vector.shape_cast %87 : vector<16xf32> to vector<1x16xf32>
    %89 = arith.mulf %78, %81 : vector<16x16xf32>
    %cst_55 = arith.constant dense<0.000000e+00> : vector<16xf32>
    %90 = vector.multi_reduction <add>, %89, %cst_55 [0] : vector<16x16xf32> to vector<16xf32>
    %91 = vector.shape_cast %90 : vector<16xf32> to vector<1x16xf32>
    %92 = arith.mulf %31, %35 : vector<16x16xf32>
    %c3_i32 = arith.constant 3 : i32
    %93 = vector.broadcast %c3_i32 : i32 to vector<16x16xi32>
    %94 = arith.cmpi eq, %4, %93 : vector<16x16xi32>
    %95 = arith.extui %94 : vector<16x16xi1> to vector<16x16xi32>
    %96 = arith.sitofp %95 : vector<16x16xi32> to vector<16x16xf32>
    %c0_56 = arith.constant 0 : index
    %c3_57 = arith.constant 3 : index
    %c0_58 = arith.constant 0 : index
    %c0_59 = arith.constant 0 : index
    %97 = vector.load %arg3[%c0_56, %c3_57, %c0_58, %c0_59] : memref<1x4x16x16xf32, #tpu.memory_space<vmem>>, vector<1x1x16x16xf32>
    %98 = vector.shape_cast %97 : vector<1x1x16x16xf32> to vector<16x16xf32>
    %99 = arith.subf %37, %98 : vector<16x16xf32>
    %100 = arith.mulf %96, %92 : vector<16x16xf32>
    %cst_60 = arith.constant dense<0.000000e+00> : vector<16xf32>
    %101 = vector.multi_reduction <add>, %100, %cst_60 [0] : vector<16x16xf32> to vector<16xf32>
    %102 = vector.shape_cast %101 : vector<16xf32> to vector<1x16xf32>
    %cst_61 = arith.constant dense<0.000000e+00> : vector<16xf32>
    %103 = vector.multi_reduction <add>, %92, %cst_61 [0] : vector<16x16xf32> to vector<16xf32>
    %104 = vector.shape_cast %103 : vector<16xf32> to vector<1x16xf32>
    %cst_62 = arith.constant dense<0.000000e+00> : vector<16xf32>
    %105 = vector.multi_reduction <add>, %96, %cst_62 [0] : vector<16x16xf32> to vector<16xf32>
    %106 = vector.shape_cast %105 : vector<16xf32> to vector<1x16xf32>
    %107 = arith.mulf %96, %99 : vector<16x16xf32>
    %cst_63 = arith.constant dense<0.000000e+00> : vector<16xf32>
    %108 = vector.multi_reduction <add>, %107, %cst_63 [0] : vector<16x16xf32> to vector<16xf32>
    %109 = vector.shape_cast %108 : vector<16xf32> to vector<1x16xf32>
    %c0_64 = arith.constant 0 : index
    %c0_65 = arith.constant 0 : index
    %c0_66 = arith.constant 0 : index
    %110 = vector.load %arg5[%c0_64, %c0_65, %c0_66] : memref<1x16x16xf32, #tpu.memory_space<vmem>>, vector<1x16x16xf32>
    %111 = vector.shape_cast %110 : vector<1x16x16xf32> to vector<16x16xf32>
    %112 = tpu.concatenate %48, %66, %84, %102, %50, %68, %86, %104, %52, %70, %88, %106, %55, %73, %91, %109 in 0 : vector<1x16xf32>, vector<1x16xf32>, vector<1x16xf32>, vector<1x16xf32>, vector<1x16xf32>, vector<1x16xf32>, vector<1x16xf32>, vector<1x16xf32>, vector<1x16xf32>, vector<1x16xf32>, vector<1x16xf32>, vector<1x16xf32>, vector<1x16xf32>, vector<1x16xf32>, vector<1x16xf32>, vector<1x16xf32> -> vector<16x16xf32>
    %113 = arith.addf %111, %112 : vector<16x16xf32>
    %c0_67 = arith.constant 0 : index
    %c0_68 = arith.constant 0 : index
    %c0_69 = arith.constant 0 : index
    %114 = vector.load %arg5[%c0_67, %c0_68, %c0_69] : memref<1x16x16xf32, #tpu.memory_space<vmem>>, vector<1x16x16xf32>
    %115 = vector.shape_cast %114 : vector<1x16x16xf32> to vector<16x16xf32>
    %116 = vector.shape_cast %113 : vector<16x16xf32> to vector<1x16x16xf32>
    tpu.vector_store %arg5[%c0_67, %c0_68, %c0_69], %116 {strides = array<i32>} : memref<1x16x16xf32, #tpu.memory_space<vmem>>, vector<1x16x16xf32>,
    return
  }
  func.func @transform_0(%arg0: i32, %arg1: i32, %arg2: i32) -> (i32, i32, i32, i32) {
    %c0_i32 = arith.constant 0 : i32
    %c0_i32_0 = arith.constant 0 : i32
    return %arg0, %c0_i32, %arg2, %arg1 : i32, i32, i32, i32
  }
  func.func @transform_1(%arg0: i32, %arg1: i32, %arg2: i32) -> (i32, i32, i32) {
    %c0_i32 = arith.constant 0 : i32
    return %arg0, %arg2, %arg1 : i32, i32, i32
  }
  func.func @transform_2(%arg0: i32, %arg1: i32, %arg2: i32) -> (i32, i32, i32) {
    %c0_i32 = arith.constant 0 : i32
    %c0_i32_0 = arith.constant 0 : i32
    return %arg0, %c0_i32, %arg1 : i32, i32, i32
  }
}

</mosaic_0001>

<bundles_post_ra>
// kernel: bce_tversky_loss.1
= control target key start
LH: loop header
LB: loop body
LE: loop exit
PB: predicated region body
PF: predicated region fallthrough
CT: control target
= control target key end

     0   :  { %7 = vsyncpa [#allocation3], 0  ;;  %s1220_s0 = inlined_call_operand.hbm [shape: f32[2,4,16,16], index: 0, kind: input, shape index: {}]   ;;  %s1221_s1 = inlined_call_operand.hbm [shape: s32[2,16,16], index: 1, kind: input, shape index: {}]   ;;  %s1222_s2 = inlined_call_operand.vmem [shape: f32[2,16,16], index: 2, kind: output, shape index: {}]  }
   0x1   :  { %9 = vsyncpa [#allocation3 + $0x1], 0 }
   0x2   :  { %10 = vsyncpa [#allocation5], 0 }
   0x3   :  { %12 = vsyncpa [#allocation5 + $0x1], 0  ;;  %s921_s9 = smov 0   ;;  %s923_s10 = smov 0  }
   0x4   :  { %s925_s11 = smov 0   ;;  %s927_s12 = smov 0  }
   0x5   :  { %s929_s13 = smov 0   ;;  %s931_s14 = smov 0  }
   0x6 LB: > { %s666_s15 = sadd.s32 4294967295, %s901_s14   ;;  %s37_s16 = sadd.s32 1, %s897_s13  ;;  %s901_s14 = sphi %s931_s14, %s18_s14   ;;  %s897_s13 = sphi %s929_s13, %s1230_s13   ;;  %s893_s12 = sphi %s927_s12, %s1229_s12   ;;  %s889_s11 = sphi %s925_s11, %s1228_s11   ;;  %s885_s10 = sphi %s923_s10, %s1227_s10   ;;  %s881_s9 = sphi %s921_s9, %s1226_s9  }
   0x7   : > { %p39_p0 = scmp.ge.s32.totalorder %s37_s16, 2  ;;  %s48_s17 = sadd.s32 1, %s889_s11 }
   0x8   : > { %p55_p1 = scmp.ne.s32.totalorder %s889_s11, %s885_s10  ;;  %p56_p2 = scmp.eq.s32.totalorder %s901_s14, 0 }
   0x9   : > { %s1232_s16 = smov (%p39_p0, %s37_s16), 0  ;;  %p61_p4 = scmp.ne.s32.totalorder %s885_s10, %s881_s9 }
   0xa   : > { %p957_p3 = por %p56_p2, %p55_p1  ;;  %s41_s19 = ssub.s32 %s897_s13, %s1232_s16 }
   0xb   : > { %p62_p5 = scmp.eq.s32.totalorder %s666_s15, 0  ;;  %p46_p6 = scmp.eq.s32.totalorder %s41_s19, 0 }
   0xc   : > { %p711_p8 = scmp.lt.s32.totalorder %s901_s14, 2  ;;  %s973_s22 = sand.u32 1, %s889_s11  }
   0xd   : > { %p964_p7 = por %p62_p5, %p61_p4  ;;  %s697_s23 = sshll.u32 %s897_s13, 6 }
   0xe   : > { %s970_s21 = scalar_select %p46_p6, %s889_s11, %s48_s17  }
   0xf   : > { %s670_s24 = sshll.u32 %s973_s22, 6  ;;  %s155_s27 = scalar_lea.hbm %s1220_s0, %s697_s23 }
  0x10   : > { %s156_s28 = sshll.u32 %s155_s27, 4  ;;  %s147_s29 = scalar_lea.vmem [#allocation2], %s670_s24  ;;  %s157_s28 = int_to_ptr.hbm [resolvable:$true] %s156_s28 }
  0x11   : > { %s158_s30 = sshll.u32 %s147_s29, 4  ;;  %p982_p9 = pnand %p711_p8, %p957_p3  ;;  %s159_s30 = int_to_ptr.vmem [resolvable:$true] %s158_s30 }
  0x12   : > { %p676_p10 = scmp.ge.s32.totalorder %s901_s14, 1  ;;  %p191_p11 = scmp.lt.s32.totalorder %s901_s14, 3 }
  0x13   : > { %s144_s4 = scalar_lea.sflag [#allocation3], %s973_s22  ;;  %s903_s5 = smov 128  }
  0x14   : > { %s904_s6 = smov 8   ;;  %p192_p12 = pnand %p676_p10, %p191_p11 }
  0x15   : > { %707 = dma.hbm_to_vmem [thread:$0]  (!%p982_p9), %s157_s28, 1024, %s159_s30, %s144_s4, %s903_s5, %s903_s5, %s904_s6  }
  0x16   : > { %s673_s7 = sshll.u32 %s973_s22, 4  ;;  %s698_s8 = sshll.u32 %s897_s13, 4 }
  0x17   : > { %s180_s17 = scalar_lea.hbm %s1221_s1, %s698_s8  ;;  %s172_s19 = scalar_lea.vmem [#allocation4], %s673_s7 }
  0x18   : > { %s181_s18 = sshll.u32 %s180_s17, 4  ;;  %s183_s23 = sshll.u32 %s172_s19, 4  ;;  %s182_s18 = int_to_ptr.hbm [resolvable:$true] %s181_s18  ;;  %s184_s23 = int_to_ptr.vmem [resolvable:$true] %s183_s23 }
  0x19   : > { %s169_s24 = scalar_lea.sflag [#allocation5], %s973_s22  ;;  %195 = sbr.rel (%p192_p12) target bundleno = 124 (0x7c), region = 28 }
  0x1a   : > { %710 = dma.hbm_to_vmem [thread:$0]  (!%p982_p9), %s182_s18, 256, %s184_s23, %s169_s24, %s903_s5, %s903_s5, %s904_s6  }
  0x1b   : > { %s197_s25 = sand.u32 (!%p192_p12), 1, %s885_s10  }
  0x1c   : > { %s677_s26 = sshll.u32 (!%p192_p12), %s197_s25, 6  ;;  %s198_s27 = scalar_lea.sflag (!%p192_p12), [#allocation3], %s197_s25 }
  0x1d   : > { %s201_s28 = scalar_lea.vmem (!%p192_p12), [#allocation2], %s677_s26 }
  0x1e   : > { %872 = dma.done.wait (%p964_p7), %s198_s27, 1024  }
  0x1f   : > { %874 = vsyncadd (%p964_p7), %s198_s27, 4294966272  ;;  %s678_s29 = sshll.u32 %s197_s25, 4  ;;  %s208_s30 = scalar_lea.sflag [#allocation5], %s197_s25 }
  0x20   : > { %s1004_s4 = scalar_lea.vmem [#allocation4], %s678_s29 }
  0x21   : > { %876 = dma.done.wait (%p964_p7), %s208_s30, 256  }
  0x22   : > { %878 = vsyncadd (%p964_p7), %s208_s30, 4294967040  ;;  %p243_p13 = scmp.lt.s32.totalorder %s893_s12, 1  ;;  %vm255_vm0 = vcmask 130048   ;;  %v905_v0 = vmov 0.0   ;;  %v1023_v1 = vld [vmem:[%s201_s28] sm:$0xff]  ;;  %v1025_v2 = vld [vmem:[%s201_s28 + $0x8] sm:$0xff] }
  0x23   : > { %v1027_v3 = vld [vmem:[%s201_s28 + $0x10] sm:$0xff]  ;;  %v1029_v4 = vld [vmem:[%s201_s28 + $0x18] sm:$0xff]  ;;  %v1035_v7 = vld [vmem:[%s201_s28 + $0x20] sm:$0xff]  ;;  %vm518_vm9 = vcmask 1040384   ;;  %vm520_vm10 = vcmask 1041408   ;;  %vm522_vm11 = vcmask 1042432  }
  0x24   : > { %s1234_s12 = smov (!%p243_p13, %s893_s12), 1  ;;  %v265_v5 = vmax.f32 %v1023_v1, %v1027_v3  ;;  %v266_v6 = vmax.f32 %v1025_v2, %v1029_v4  ;;  %v1037_v8 = vld [vmem:[%s201_s28 + $0x28] sm:$0xff]  ;;  %v1039_v9 = vld [vmem:[%s201_s28 + $0x30] sm:$0xff]  ;;  %v1041_v10 = vld [vmem:[%s201_s28 + $0x38] sm:$0xff]  ;;  %vm524_vm12 = vcmask 1043456   ;;  %vm526_vm13 = vcmask 1044480  }
  0x25   : > { %s699_s22 = sshll.u32 %s1234_s12, 4  ;;  %v258_v31 = vld [vmem:[%s1004_s4] sm:$0xff]  ;;  %v259_v32 = vld [vmem:[%s1004_s4 + $0x8] sm:$0xff]  ;;  %vm528_vm14 = vcmask 1045504   ;;  %vm530_vm15 = vcmask 1046528  }
  0x26   : > { %s1015_s6 = scalar_lea.vmem %s1222_s2, %s699_s22  ;;  %v270_v11 = vmax.f32 %v265_v5, %v1035_v7  ;;  %v271_v12 = vmax.f32 %v266_v6, %v1037_v8  ;;  %vm368_vm1 = vcmp.eq.s32.totalorder %v258_v31, 1  ;;  %vm369_vm2 = vcmp.eq.s32.totalorder %v259_v32, 1 }
  0x27   : > { %256 = vst.msk [vmem:[%s1015_s6] sm:$0xff] %vm255_vm0, %v905_v0  ;;  %vm317_vm3 = vcmp.eq.s32.totalorder %v258_v31, 0  ;;  %vm318_vm4 = vcmp.eq.s32.totalorder %v259_v32, 0  ;;  %v1070_v40 = vsel %vm368_vm1, 1.0, %v905_v0  ;;  %v1073_v41 = vsel %vm369_vm2, 1.0, %v905_v0 }
  0x28   : > { %257 = vst.msk [vmem:[%s1015_s6 + $0x8] sm:$0xff] %vm255_vm0, %v905_v0  ;;  %v1046_v13 = vmax.f32 %v270_v11, %v1039_v9  ;;  %v1049_v14 = vmax.f32 %v271_v12, %v1041_v10  ;;  %v396_v44 = vsel %vm255_vm0, %v1070_v40, 0.0  ;;  %v397_v45 = vsel %vm255_vm0, %v1073_v41, 0.0 }
  0x29   : > { %v1080_v48 = vsel %vm317_vm3, 1.0, %v905_v0  ;;  %v1083_v49 = vsel %vm318_vm4, 1.0, %v905_v0  ;;  %vm418_vm5 = vcmp.eq.s32.totalorder %v258_v31, 2  ;;  %vm419_vm6 = vcmp.eq.s32.totalorder %v259_v32, 2 }
  0x2a   : > { %v277_v15 = vsub.f32 %v1023_v1, %v1046_v13  ;;  %v278_v16 = vsub.f32 %v1025_v2, %v1049_v14  ;;  %v283_v17 = vsub.f32 %v1027_v3, %v1046_v13  ;;  %v284_v18 = vsub.f32 %v1029_v4, %v1049_v14 }
  0x2b   : > { %v289_v19 = vsub.f32 %v1035_v7, %v1046_v13  ;;  %v290_v20 = vsub.f32 %v1037_v8, %v1049_v14  ;;  %v295_v24 = vsub.f32 %v1039_v9, %v1046_v13  ;;  %v296_v26 = vsub.f32 %v1041_v10, %v1049_v14 }
  0x2c   : > { %v279_v21 = vmul.f32 1.442695, %v277_v15  ;;  %v281_v22 = vmul.f32 1.442695, %v278_v16  ;;  %v285_v23 = vmul.f32 1.442695, %v283_v17  ;;  %v398_v56 = vadd.f32 %v397_v45, %v396_v44 }
  0x2d   : > { %v287_v25 = vmul.f32 1.442695, %v284_v18  ;;  %v291_v27 = vmul.f32 1.442695, %v289_v19  ;;  %v293_v28 = vmul.f32 1.442695, %v290_v20 }
  0x2e   : > { %763 = vpow2.f32 %v279_v21  ;;  %v297_v29 = vmul.f32 1.442695, %v295_v24  ;;  %v299_v30 = vmul.f32 1.442695, %v296_v26  ;;  %v346_v52 = vsel %vm255_vm0, %v1080_v48, 0.0 }
  0x2f   : > { %765 = vpow2.f32 %v281_v22  ;;  %v347_v53 = vsel %vm255_vm0, %v1083_v49, 0.0  ;;  %vm468_vm7 = vcmp.eq.s32.totalorder %v258_v31, 3  ;;  %vm469_vm8 = vcmp.eq.s32.totalorder %v259_v32, 3 }
  0x30   : > { %767 = vpow2.f32 %v285_v23  ;;  %v348_v55 = vadd.f32 %v347_v53, %v346_v52  ;;  %v1090_v57 = vsel %vm418_vm5, 1.0, %v905_v0  ;;  %v1093_v58 = vsel %vm419_vm6, 1.0, %v905_v0 }
  0x31   : > { %769 = vpow2.f32 %v287_v25  ;;  %v399_v60 = vrot.slane %v398_v56, 4  ;;  %v446_v61 = vsel %vm255_vm0, %v1090_v57, 0.0  ;;  %v447_v62 = vsel %vm255_vm0, %v1093_v58, 0.0 }
  0x32   : > { %771 = vpow2.f32 %v291_v27  ;;  %v349_v59 = vrot.slane %v348_v55, 4  ;;  %v1100_v63 = vsel %vm468_vm7, 1.0, %v905_v0  ;;  %v1103_v5 = vsel %vm469_vm8, 1.0, %v905_v0 }
  0x33   : > { %773 = vpow2.f32 %v293_v28  ;;  %v1107_v6 = vsel %vm255_vm0, %v1100_v63, 0.0  ;;  %v1111_v11 = vsel %vm255_vm0, %v1103_v5, 0.0  ;;  %v1115_v16 = vadd.f32 %v399_v60, %v398_v56 }
  0x34   : > { %v764_v33 = vpop.eup %763  ;;  %775 = vpow2.f32 %v297_v29  ;;  %v1113_v15 = vadd.f32 %v349_v59, %v348_v55  ;;  %v1117_v17 = vadd.f32 %v447_v62, %v446_v61 }
  0x35   : > { %v766_v34 = vpop.eup %765  ;;  %777 = vpow2.f32 %v299_v30 }
  0x36   : > { %v768_v35 = vpop.eup %767 }
  0x37   : > { %v770_v36 = vpop.eup %769  ;;  %v301_v37 = vadd.f32 %v768_v35, %v764_v33 }
  0x38   : > { %v772_v38 = vpop.eup %771  ;;  %v302_v39 = vadd.f32 %v770_v36, %v766_v34 }
  0x39   : > { %v774_v42 = vpop.eup %773  ;;  %v303_v43 = vadd.f32 %v772_v38, %v301_v37 }
  0x3a   : > { %v776_v46 = vpop.eup %775  ;;  %v304_v47 = vadd.f32 %v774_v42, %v302_v39 }
  0x3b   : > { %v778_v50 = vpop.eup %777  ;;  %v305_v51 = vadd.f32 %v776_v46, %v303_v43 }
  0x3c   : > { %v306_v54 = vadd.f32 %v778_v50, %v304_v47 }
  0x3d   : > { %779 = vrcp.f32 %v305_v51 }
  0x3e   : > { %781 = vrcp.f32 %v306_v54 }
  0x3f   : > { %783 = vlog2.f32 %v305_v51 }
  0x40   : > { %785 = vlog2.f32 %v306_v54 }
  0x43   : > { %v780_v12 = vpop.eup %779 }
  0x44   : > { %v782_v18 = vpop.eup %781  ;;  %v315_v0 = vmul.f32 %v780_v12, %v764_v33  ;;  %v366_v19 = vmul.f32 %v780_v12, %v768_v35  ;;  %v416_v20 = vmul.f32 %v780_v12, %v772_v38  ;;  %v466_v21 = vmul.f32 %v780_v12, %v776_v46 }
  0x45   : > { %v316_v22 = vmul.f32 %v782_v18, %v766_v34  ;;  %v367_v23 = vmul.f32 %v782_v18, %v770_v36  ;;  %v417_v24 = vmul.f32 %v782_v18, %v774_v42  ;;  %v467_v25 = vmul.f32 %v782_v18, %v778_v50  ;;  %v1127_v34 = vpop.eup %783 }
  0x46   : > { %v325_v26 = vmul.f32 %v1080_v48, %v315_v0  ;;  %v337_v27 = vsel %vm255_vm0, %v315_v0, 0.0  ;;  %v376_v28 = vmul.f32 %v1070_v40, %v366_v19  ;;  %v387_v29 = vsel %vm255_vm0, %v366_v19, 0.0  ;;  %v786_v39 = vpop.eup %785 }
  0x47   : > { %v326_v30 = vmul.f32 %v1083_v49, %v316_v22  ;;  %v338_v31 = vsel %vm255_vm0, %v316_v22, 0.0  ;;  %v377_v32 = vmul.f32 %v1073_v41, %v367_v23  ;;  %v388_v33 = vsel %vm255_vm0, %v367_v23, 0.0 }
  0x48   : > { %v328_v35 = vsel %vm255_vm0, %v325_v26, 0.0  ;;  %v339_v36 = vadd.f32 %v338_v31, %v337_v27  ;;  %v378_v37 = vsel %vm255_vm0, %v376_v28, 0.0  ;;  %v389_v38 = vadd.f32 %v388_v33, %v387_v29 }
  0x49   : > { %v329_v42 = vsel %vm255_vm0, %v326_v30, 0.0  ;;  %v379_v43 = vsel %vm255_vm0, %v377_v32, 0.0  ;;  %v426_v44 = vmul.f32 %v1090_v57, %v416_v20  ;;  %v427_v45 = vmul.f32 %v1093_v58, %v417_v24 }
  0x4a   : > { %v330_v46 = vadd.f32 %v329_v42, %v328_v35  ;;  %v340_v47 = vrot.slane %v339_v36, 4  ;;  %v380_v50 = vadd.f32 %v379_v43, %v378_v37  ;;  %v390_v51 = vrot.slane %v389_v38, 4 }
  0x4b   : > { %v428_v52 = vsel %vm255_vm0, %v426_v44, 0.0  ;;  %v429_v53 = vsel %vm255_vm0, %v427_v45, 0.0  ;;  %v437_v54 = vsel %vm255_vm0, %v416_v20, 0.0  ;;  %v438_v55 = vsel %vm255_vm0, %v417_v24, 0.0 }
  0x4c   : > { %v331_v56 = vrot.slane %v330_v46, 4  ;;  %v341_v59 = vadd.f32 %v340_v47, %v339_v36  ;;  %v381_v60 = vrot.slane %v380_v50, 4  ;;  %v391_v61 = vadd.f32 %v390_v51, %v389_v38 }
  0x4d   : > { %v430_v62 = vadd.f32 %v429_v53, %v428_v52  ;;  %v439_v12 = vadd.f32 %v438_v55, %v437_v54  ;;  %v476_v18 = vmul.f32 %v1100_v63, %v466_v21  ;;  %v477_v0 = vmul.f32 %v1103_v5, %v467_v25 }
  0x4e   : > { %v332_v19 = vadd.f32 %v331_v56, %v330_v46  ;;  %v342_v22 = vrot.slane %v341_v59, 2  ;;  %v382_v23 = vadd.f32 %v381_v60, %v380_v50  ;;  %v392_v26 = vrot.slane %v391_v61, 2 }
  0x4f   : > { %v431_v27 = vrot.slane %v430_v62, 4  ;;  %v440_v28 = vrot.slane %v439_v12, 4  ;;  %v478_v20 = vsel %vm255_vm0, %v476_v18, 0.0  ;;  %v479_v24 = vsel %vm255_vm0, %v477_v0, 0.0 }
  0x50   : > { %v333_v29 = vrot.slane %v332_v19, 2  ;;  %v343_v30 = vadd.f32 %v342_v22, %v341_v59  ;;  %v383_v31 = vrot.slane %v382_v23, 2  ;;  %v351_v32 = vrot.slane %v1113_v15, 2 }
  0x51   : > { %v432_v33 = vadd.f32 %v431_v27, %v430_v62  ;;  %v441_v35 = vadd.f32 %v440_v28, %v439_v12  ;;  %v480_v36 = vadd.f32 %v479_v24, %v478_v20  ;;  %v401_v37 = vrot.slane %v1115_v16, 2 }
  0x52   : > { %v334_v38 = vadd.f32 %v333_v29, %v332_v19  ;;  %v384_v42 = vadd.f32 %v383_v31, %v382_v23  ;;  %v393_v43 = vadd.f32 %v392_v26, %v391_v61  ;;  %v487_v44 = vsel %vm255_vm0, %v466_v21, 0.0 }
  0x53   : > { %v433_v45 = vrot.slane %v432_v33, 2  ;;  %v442_v46 = vrot.slane %v441_v35, 2  ;;  %v481_v47 = vrot.slane %v480_v36, 4  ;;  %v488_v50 = vsel %vm255_vm0, %v467_v25, 0.0 }
  0x54   : > { %v335_v51 = vrot.slane %v334_v38, 1  ;;  %v344_v52 = vrot.slane %v343_v30, 1  ;;  %v385_v53 = vrot.slane %v384_v42, 1  ;;  %v449_v54 = vrot.slane %v1117_v17, 4 }
  0x55   : > { %v434_v55 = vadd.f32 %v433_v45, %v432_v33  ;;  %v443_v56 = vadd.f32 %v442_v46, %v441_v35  ;;  %v482_v59 = vadd.f32 %v481_v47, %v480_v36  ;;  %v489_v60 = vadd.f32 %v488_v50, %v487_v44 }
  0x56   : > { %v336_v62 = vadd.f32 %v335_v51, %v334_v38  ;;  %v386_v61 = vadd.f32 %v385_v53, %v384_v42  ;;  %v310_v21 = vmul.f32 0.6931472, %v1127_v34  ;;  %v312_v12 = vmul.f32 0.6931472, %v786_v39  ;;  %v516_v53 = vld [vmem:[%s1015_s6] sm:$0xff] }
  0x57   : > { %v394_v18 = vrot.slane %v393_v43, 1  ;;  %v435_v0 = vrot.slane %v434_v55, 1  ;;  %v483_v25 = vrot.slane %v482_v59, 2  ;;  %v490_v19 = vrot.slane %v489_v60, 4 }
  0x58   : > { %v345_v22 = vadd.f32 %v344_v52, %v343_v30  ;;  %v444_v23 = vrot.slane %v443_v56, 1  ;;  %v313_v26 = vadd.f32 %v310_v21, %v1046_v13  ;;  %v314_v27 = vadd.f32 %v312_v12, %v1049_v14 }
  0x59   : > { %v436_v28 = vadd.f32 %v435_v0, %v434_v55  ;;  %v484_v20 = vadd.f32 %v483_v25, %v482_v59  ;;  %v491_v24 = vadd.f32 %v490_v19, %v489_v60  ;;  %v519_v29 = vsel %vm518_vm9, %v336_v62, %v386_v61 }
  0x5a   : > { %v323_v34 = vsub.f32 %v313_v26, %v1023_v1  ;;  %v324_v39 = vsub.f32 %v314_v27, %v1025_v2  ;;  %v352_v31 = vadd.f32 %v351_v32, %v1113_v15  ;;  %v374_v33 = vsub.f32 %v313_v26, %v1027_v3 }
  0x5b   : > { %v395_v30 = vadd.f32 %v394_v18, %v393_v43  ;;  %v485_v35 = vrot.slane %v484_v20, 1  ;;  %v492_v36 = vrot.slane %v491_v24, 2  ;;  %v375_v13 = vsub.f32 %v314_v27, %v1029_v4 }
  0x5c   : > { %v445_v38 = vadd.f32 %v444_v23, %v443_v56  ;;  %v521_v14 = vsel %vm520_vm10, %v519_v29, %v436_v28  ;;  %v355_v42 = vmul.f32 %v1080_v48, %v323_v34  ;;  %v356_v44 = vmul.f32 %v1083_v49, %v324_v39 }
  0x5d   : > { %v486_v45 = vadd.f32 %v485_v35, %v484_v20  ;;  %v493_v1 = vadd.f32 %v492_v36, %v491_v24  ;;  %v405_v2 = vmul.f32 %v1070_v40, %v374_v33  ;;  %v406_v15 = vmul.f32 %v1073_v41, %v375_v13 }
  0x5e   : > { %v353_v3 = vrot.slane %v352_v31, 1  ;;  %v357_v32 = vsel %vm255_vm0, %v355_v42, 0.0  ;;  %v358_v43 = vsel %vm255_vm0, %v356_v44, 0.0  ;;  %v424_v4 = vsub.f32 %v313_v26, %v1035_v7 }
  0x5f   : > { %v494_v46 = vrot.slane %v493_v1, 1  ;;  %v523_v47 = vsel %vm522_vm11, %v521_v14, %v486_v45  ;;  %v359_v48 = vadd.f32 %v358_v43, %v357_v32  ;;  %v407_v49 = vsel %vm255_vm0, %v405_v2, 0.0 }
  0x60   : > { %v525_v50 = vsel %vm524_vm12, %v523_v47, %v345_v22  ;;  %v402_v40 = vadd.f32 %v401_v37, %v1115_v16  ;;  %v408_v41 = vsel %vm255_vm0, %v406_v15, 0.0  ;;  %v425_v51 = vsub.f32 %v314_v27, %v1037_v8 }
  0x61   : > { %v495_v52 = vadd.f32 %v494_v46, %v493_v1  ;;  %v527_v7 = vsel %vm526_vm13, %v525_v50, %v395_v30  ;;  %v360_v55 = vrot.slane %v359_v48, 4  ;;  %v409_v56 = vadd.f32 %v408_v41, %v407_v49  ;;  %v517_v41 = vld [vmem:[%s1015_s6 + $0x8] sm:$0xff] }
  0x62   : > { %v529_v59 = vsel %vm528_vm14, %v527_v7, %v445_v38  ;;  %v450_v60 = vadd.f32 %v449_v54, %v1117_v17  ;;  %v455_v62 = vmul.f32 %v1090_v57, %v424_v4  ;;  %v456_v61 = vmul.f32 %v1093_v58, %v425_v51 }
  0x63   : > { %v531_v16 = vsel %vm530_vm15, %v529_v59, %v495_v52  ;;  %v361_v37 = vadd.f32 %v360_v55, %v359_v48  ;;  %v410_v21 = vrot.slane %v409_v56, 4  ;;  %v474_v8 = vsub.f32 %v313_v26, %v1039_v9 }
  0x64   : > { %v539_v12 = vadd.f32 %v531_v16, %v516_v53  ;;  %v451_v18 = vrot.slane %v450_v60, 2  ;;  %v457_v0 = vsel %vm255_vm0, %v455_v62, 0.0  ;;  %v458_v25 = vsel %vm255_vm0, %v456_v61, 0.0 }
  0x65   : > { %v362_v19 = vrot.slane %v361_v37, 2  ;;  %v411_v22 = vadd.f32 %v410_v21, %v409_v56  ;;  %v459_v23 = vadd.f32 %v458_v25, %v457_v0  ;;  %v475_v17 = vsub.f32 %v314_v27, %v1041_v10 }
  0x66   : > { %541 = vst.msk [vmem:[%s1015_s6] sm:$0xff] %vm255_vm0, %v539_v12  ;;  %v403_v57 = vrot.slane %v402_v40, 1  ;;  %v452_v58 = vadd.f32 %v451_v18, %v450_v60  ;;  %v498_v54 = vadd.f32 %v1111_v11, %v1107_v6  ;;  %v505_v9 = vmul.f32 %v1100_v63, %v474_v8 }
  0x67   : > { %v412_v26 = vrot.slane %v411_v22, 2  ;;  %v460_v28 = vrot.slane %v459_v23, 4  ;;  %v506_v20 = vmul.f32 %v1103_v5, %v475_v17  ;;  %v354_v24 = vadd.f32 %v353_v3, %v352_v31 }
  0x68   : > { %v499_v29 = vrot.slane %v498_v54, 4  ;;  %v507_v34 = vsel %vm255_vm0, %v505_v9, 0.0  ;;  %v363_v39 = vadd.f32 %v362_v19, %v361_v37  ;;  %v453_v33 = vrot.slane %v452_v58, 1 }
  0x69   : > { %v461_v10 = vadd.f32 %v460_v28, %v459_v23  ;;  %v508_v27 = vsel %vm255_vm0, %v506_v20, 0.0  ;;  %v404_v30 = vadd.f32 %v403_v57, %v402_v40  ;;  %v413_v35 = vadd.f32 %v412_v26, %v411_v22 }
  0x6a   : > { %v500_v36 = vadd.f32 %v499_v29, %v498_v54  ;;  %v509_v13 = vadd.f32 %v508_v27, %v507_v34  ;;  %v364_v38 = vrot.slane %v363_v39, 1  ;;  %v454_v14 = vadd.f32 %v453_v33, %v452_v58 }
  0x6b   : > { %v462_v6 = vrot.slane %v461_v10, 2  ;;  %v414_v5 = vrot.slane %v413_v35, 1  ;;  %v532_v45 = vsel %vm518_vm9, %v354_v24, %v404_v30 }
  0x6c   : > { %v501_v11 = vrot.slane %v500_v36, 2  ;;  %v510_v63 = vrot.slane %v509_v13, 4  ;;  %v365_v3 = vadd.f32 %v364_v38, %v363_v39  ;;  %v533_v32 = vsel %vm520_vm10, %v532_v45, %v454_v14 }
  0x6d   : > { %v463_v42 = vadd.f32 %v462_v6, %v461_v10  ;;  %v415_v43 = vadd.f32 %v414_v5, %v413_v35 }
  0x6e   : > { %v502_v31 = vadd.f32 %v501_v11, %v500_v36  ;;  %v511_v44 = vadd.f32 %v510_v63, %v509_v13 }
  0x6f   : > { %v464_v1 = vrot.slane %v463_v42, 1 }
  0x70   : > { %v503_v2 = vrot.slane %v502_v31, 1  ;;  %v512_v15 = vrot.slane %v511_v44, 2 }
  0x71   : > { %v465_v47 = vadd.f32 %v464_v1, %v463_v42 }
  0x72   : > { %v504_v4 = vadd.f32 %v503_v2, %v502_v31  ;;  %v513_v46 = vadd.f32 %v512_v15, %v511_v44 }
  0x74   : > { %v514_v48 = vrot.slane %v513_v46, 1  ;;  %v534_v49 = vsel %vm522_vm11, %v533_v32, %v504_v4 }
  0x75   : > { %v535_v50 = vsel %vm524_vm12, %v534_v49, %v365_v3 }
  0x76   : > { %v515_v40 = vadd.f32 %v514_v48, %v513_v46  ;;  %v536_v51 = vsel %vm526_vm13, %v535_v50, %v415_v43 }
  0x77   : > { %v537_v52 = vsel %vm528_vm14, %v536_v51, %v465_v47 }
  0x78   : > { %v538_v53 = vsel %vm530_vm15, %v537_v52, %v515_v40 }
  0x79   : > { %v540_v7 = vadd.f32 %v538_v53, %v517_v41 }
  0x7b   : > { %542 = vst.msk [vmem:[%s1015_s6 + $0x8] sm:$0xff] %vm255_vm0, %v540_v7 }
  0x7c PF: > { %s18_s14 = sadd.s32 1, %s901_s14   ;;  %s1226_s9 = smov %s885_s10 }
  0x7d   : > { %p15_p0 = scmp.ge.s32.totalorder %s18_s14, 4   ;;  %s1227_s10 = smov %s889_s11 }
  0x7e   : > { %s1228_s11 = smov %s970_s21  ;;  %s1229_s12 = smov %s897_s13 }
  0x7f   : > { %s1230_s13 = smov %s1232_s16  ;;  %17 = sbr.rel (!%p15_p0) target bundleno = 6 (0x6), region = 88 }
  0x84   :  { %570 = vsyncpa [#allocation3], 1 }
  0x85   :  { %572 = vsyncpa [#allocation3 + $0x1], 1 }
  0x86   :  { %573 = vsyncpa [#allocation5], 1 }
  0x87   :  { %575 = vsyncpa [#allocation5 + $0x1], 1 }

</bundles_post_ra>
